<compile_context>
chip_gen: v7x
topology: tpu7x:2x2x1
jax: 0.10.0
libtpu: 0.0.40
codegen_flags: <defaults>
</compile_context>

<pallas_src>
import jax
import jax.numpy as jnp
from jax.experimental import pallas as pl
from jax.experimental.pallas import tpu as pltpu

LANE = 128
SUBLANES = 8
MAX_TILE_ROWS = 2048  # 2048 x 128 x 4B = 1 MiB per f32 input tile


def _round_up(x, m):
    return ((x + m - 1) // m) * m


def _dice_partial_kernel(x_ref, t_ref, inter_ref, denom_ref):
    """Accumulate per-chunk partial sums for binary Dice loss.

    Grid = (chunks, tiles_per_chunk). The (8, 128) output blocks stay resident
    across the inner ('arbitrary') axis and act as vector accumulators; the full
    reduction is deferred to the wrapper epilogue.
    """
    j = pl.program_id(1)

    @pl.when(j == 0)
    def _():
        inter_ref[...] = jnp.zeros_like(inter_ref)
        denom_ref[...] = jnp.zeros_like(denom_ref)

    x = x_ref[...].astype(jnp.float32)
    t = t_ref[...].astype(jnp.float32)

    # sigmoid(x) = 0.5 * (tanh(x / 2) + 1): single EUP transcendental.
    # Padded logits hold the most-negative finite value -> p == 0 exactly, and
    # padded targets are 0, so padding contributes nothing to either sum.
    p = 0.5 * jnp.tanh(0.5 * x) + 0.5

    rows = x.shape[0]
    groups = rows // SUBLANES
    inter_ref[...] += (p * t).reshape(groups, SUBLANES, LANE).sum(axis=0)
    denom_ref[...] += (p + t).reshape(groups, SUBLANES, LANE).sum(axis=0)


def dice_loss_binary(inputs, targets, smooth=1.0):
    """Pallas equivalent of DiceLoss_binary.forward(inputs, targets, smooth)."""
    x = inputs.reshape(-1)
    t = targets.reshape(-1)
    if not jnp.issubdtype(x.dtype, jnp.floating):
        x = x.astype(jnp.float32)

    n = x.shape[0]
    rows_needed = -(-n // LANE)
    # Sublane alignment of 32 covers f32 / bf16 / 8-bit layouts.
    tile_rows = min(MAX_TILE_ROWS, _round_up(rows_needed, 32))
    n_tiles = -(-rows_needed // tile_rows)
    n_chunks = 2 if n_tiles >= 2 else 1          # megacore split (helps v7x)
    tiles_per_chunk = -(-n_tiles // n_chunks)
    total_rows = n_chunks * tiles_per_chunk * tile_rows
    pad = total_rows * LANE - n

    # Fusible padding (no host-side concatenate copies, no mask stream).
    neg = jnp.finfo(x.dtype).min
    x2 = jnp.pad(x, (0, pad), constant_values=neg).reshape(total_rows, LANE)
    t2 = jnp.pad(t, (0, pad)).reshape(total_rows, LANE)

    in_block = pl.BlockSpec(
        (tile_rows, LANE), lambda i, j: (i * tiles_per_chunk + j, 0))
    out_block = pl.BlockSpec((None, SUBLANES, LANE), lambda i, j: (i, 0, 0))

    inter_part, denom_part = pl.pallas_call(
        _dice_partial_kernel,
        out_shape=(
            jax.ShapeDtypeStruct((n_chunks, SUBLANES, LANE), jnp.float32),
            jax.ShapeDtypeStruct((n_chunks, SUBLANES, LANE), jnp.float32),
        ),
        grid_spec=pltpu.PrefetchScalarGridSpec(
            num_scalar_prefetch=0,
            grid=(n_chunks, tiles_per_chunk),
            in_specs=[in_block, in_block],
            out_specs=(out_block, out_block),
        ),
        compiler_params=pltpu.CompilerParams(
            dimension_semantics=("parallel", "arbitrary")),
    )(x2, t2)

    # Tiny epilogue: final cross-lane reduction + dice formula.
    inter = jnp.sum(inter_part)
    denom = jnp.sum(denom_part)
    smooth = jnp.float32(smooth)
    dice = (2.0 * inter + smooth) / (denom + smooth)
    return 1.0 - dice


def _reference(inputs, targets, smooth=1.0):
    p = jax.nn.sigmoid(inputs.astype(jnp.float32))
    t = targets.astype(jnp.float32)
    inter = jnp.sum(p * t)
    dice = (2.0 * inter + smooth) / (jnp.sum(p) + jnp.sum(t) + smooth)
    return 1.0 - dice


if __name__ == "__main__":
    key = jax.random.PRNGKey(0)
    k1, k2 = jax.random.split(key)
    # Small shapes consistent with a binary-segmentation head: NCHW logits + {0,1} targets.
    inputs = jax.random.normal(k1, (2, 4, 16, 16), dtype=jnp.float32)
    targets = (jax.random.uniform(k2, (2, 4, 16, 16)) > 0.5).astype(jnp.float32)

    loss = dice_loss_binary(inputs, targets, smooth=1.0)
    loss = jax.block_until_ready(loss)

    ref = _reference(inputs, targets, smooth=1.0)
    assert jnp.allclose(loss, ref, atol=1e-5, rtol=1e-5), (loss, ref)
    print("KERNEL_OK")
</pallas_src>

<mosaic_0001>
module attributes {stable_mosaic.version = 11 : i64} {
  func.func @_dice_partial_kernel(%arg0: i32, %arg1: i32, %arg2: memref<32x128xf32, #tpu.memory_space<vmem>>, %arg3: memref<32x128xf32, #tpu.memory_space<vmem>>, %arg4: memref<1x8x128xf32, #tpu.memory_space<vmem>>, %arg5: memref<1x8x128xf32, #tpu.memory_space<vmem>>) attributes {dimension_semantics = [#tpu.dimension_semantics<parallel>, #tpu.dimension_semantics<arbitrary>], iteration_bounds = array<i64: 1, 1>, scalar_prefetch = 0 : i64, scratch_operands = 0 : i64, tpu.core_type = #tpu.core_type<tc>, window_params = [{transform_indices = @transform_0, window_bounds = array<i64: 32, 128>}, {transform_indices = @transform_1, window_bounds = array<i64: 32, 128>}, {transform_indices = @transform_2, window_bounds = array<i64: 1, 8, 128>}, {transform_indices = @transform_3, window_bounds = array<i64: 1, 8, 128>}]} {
    %c0_i32 = arith.constant 0 : i32
    %0 = arith.cmpi eq, %arg1, %c0_i32 : i32
    %1 = arith.extui %0 : i1 to i32
    %c0_i32_0 = arith.constant 0 : i32
    %2 = arith.cmpi ne, %1, %c0_i32_0 : i32
    scf.if %2 {
      %cst_20 = arith.constant 0.000000e+00 : f32
      %30 = vector.broadcast %cst_20 : f32 to vector<8x128xf32>
      %c0_21 = arith.constant 0 : index
      %c0_22 = arith.constant 0 : index
      %c0_23 = arith.constant 0 : index
      %31 = vector.load %arg4[%c0_21, %c0_22, %c0_23] : memref<1x8x128xf32, #tpu.memory_space<vmem>>, vector<1x8x128xf32>
      %32 = vector.shape_cast %31 : vector<1x8x128xf32> to vector<8x128xf32>
      %33 = vector.shape_cast %30 : vector<8x128xf32> to vector<1x8x128xf32>
      tpu.vector_store %arg4[%c0_21, %c0_22, %c0_23], %33 {strides = array<i32>} : memref<1x8x128xf32, #tpu.memory_space<vmem>>, vector<1x8x128xf32>,
      %cst_24 = arith.constant 0.000000e+00 : f32
      %34 = vector.broadcast %cst_24 : f32 to vector<8x128xf32>
      %c0_25 = arith.constant 0 : index
      %c0_26 = arith.constant 0 : index
      %c0_27 = arith.constant 0 : index
      %35 = vector.load %arg5[%c0_25, %c0_26, %c0_27] : memref<1x8x128xf32, #tpu.memory_space<vmem>>, vector<1x8x128xf32>
      %36 = vector.shape_cast %35 : vector<1x8x128xf32> to vector<8x128xf32>
      %37 = vector.shape_cast %34 : vector<8x128xf32> to vector<1x8x128xf32>
      tpu.vector_store %arg5[%c0_25, %c0_26, %c0_27], %37 {strides = array<i32>} : memref<1x8x128xf32, #tpu.memory_space<vmem>>, vector<1x8x128xf32>,
    } else {
    }
    %c0 = arith.constant 0 : index
    %c0_1 = arith.constant 0 : index
    %3 = vector.load %arg2[%c0, %c0_1] : memref<32x128xf32, #tpu.memory_space<vmem>>, vector<32x128xf32>
    %c0_2 = arith.constant 0 : index
    %c0_3 = arith.constant 0 : index
    %4 = vector.load %arg3[%c0_2, %c0_3] : memref<32x128xf32, #tpu.memory_space<vmem>>, vector<32x128xf32>
    %cst = arith.constant 5.000000e-01 : f32
    %5 = vector.broadcast %cst : f32 to vector<32x128xf32>
    %6 = arith.mulf %5, %3 : vector<32x128xf32>
    %7 = math.tanh %6 : vector<32x128xf32>
    %cst_4 = arith.constant 5.000000e-01 : f32
    %8 = vector.broadcast %cst_4 : f32 to vector<32x128xf32>
    %9 = arith.mulf %8, %7 : vector<32x128xf32>
    %cst_5 = arith.constant 5.000000e-01 : f32
    %10 = vector.broadcast %cst_5 : f32 to vector<32x128xf32>
    %11 = arith.addf %9, %10 : vector<32x128xf32>
    %c0_6 = arith.constant 0 : index
    %c0_7 = arith.constant 0 : index
    %c0_8 = arith.constant 0 : index
    %12 = vector.load %arg4[%c0_6, %c0_7, %c0_8] : memref<1x8x128xf32, #tpu.memory_space<vmem>>, vector<1x8x128xf32>
    %13 = vector.shape_cast %12 : vector<1x8x128xf32> to vector<8x128xf32>
    %14 = arith.mulf %11, %4 : vector<32x128xf32>
    %15 = vector.shape_cast %14 : vector<32x128xf32> to vector<4x8x128xf32>
    %cst_9 = arith.constant dense<0.000000e+00> : vector<8x128xf32>
    %16 = vector.multi_reduction <add>, %15, %cst_9 [0] : vector<4x8x128xf32> to vector<8x128xf32>
    %17 = arith.addf %13, %16 : vector<8x128xf32>
    %c0_10 = arith.constant 0 : index
    %c0_11 = arith.constant 0 : index
    %c0_12 = arith.constant 0 : index
    %18 = vector.load %arg4[%c0_10, %c0_11, %c0_12] : memref<1x8x128xf32, #tpu.memory_space<vmem>>, vector<1x8x128xf32>
    %19 = vector.shape_cast %18 : vector<1x8x128xf32> to vector<8x128xf32>
    %20 = vector.shape_cast %17 : vector<8x128xf32> to vector<1x8x128xf32>
    tpu.vector_store %arg4[%c0_10, %c0_11, %c0_12], %20 {strides = array<i32>} : memref<1x8x128xf32, #tpu.memory_space<vmem>>, vector<1x8x128xf32>,
    %c0_13 = arith.constant 0 : index
    %c0_14 = arith.constant 0 : index
    %c0_15 = arith.constant 0 : index
    %21 = vector.load %arg5[%c0_13, %c0_14, %c0_15] : memref<1x8x128xf32, #tpu.memory_space<vmem>>, vector<1x8x128xf32>
    %22 = vector.shape_cast %21 : vector<1x8x128xf32> to vector<8x128xf32>
    %23 = arith.addf %11, %4 : vector<32x128xf32>
    %24 = vector.shape_cast %23 : vector<32x128xf32> to vector<4x8x128xf32>
    %cst_16 = arith.constant dense<0.000000e+00> : vector<8x128xf32>
    %25 = vector.multi_reduction <add>, %24, %cst_16 [0] : vector<4x8x128xf32> to vector<8x128xf32>
    %26 = arith.addf %22, %25 : vector<8x128xf32>
    %c0_17 = arith.constant 0 : index
    %c0_18 = arith.constant 0 : index
    %c0_19 = arith.constant 0 : index
    %27 = vector.load %arg5[%c0_17, %c0_18, %c0_19] : memref<1x8x128xf32, #tpu.memory_space<vmem>>, vector<1x8x128xf32>
    %28 = vector.shape_cast %27 : vector<1x8x128xf32> to vector<8x128xf32>
    %29 = vector.shape_cast %26 : vector<8x128xf32> to vector<1x8x128xf32>
    tpu.vector_store %arg5[%c0_17, %c0_18, %c0_19], %29 {strides = array<i32>} : memref<1x8x128xf32, #tpu.memory_space<vmem>>, vector<1x8x128xf32>,
    return
  }
  func.func @transform_0(%arg0: i32, %arg1: i32) -> (i32, i32) {
    %c1_i32 = arith.constant 1 : i32
    %0 = arith.muli %arg0, %c1_i32 : i32
    %1 = arith.addi %0, %arg1 : i32
    %c0_i32 = arith.constant 0 : i32
    %c0_i32_0 = arith.constant 0 : i32
    return %1, %c0_i32 : i32, i32
  }
  func.func @transform_1(%arg0: i32, %arg1: i32) -> (i32, i32) {
    %c1_i32 = arith.constant 1 : i32
    %0 = arith.muli %arg0, %c1_i32 : i32
    %1 = arith.addi %0, %arg1 : i32
    %c0_i32 = arith.constant 0 : i32
    %c0_i32_0 = arith.constant 0 : i32
    return %1, %c0_i32 : i32, i32
  }
  func.func @transform_2(%arg0: i32, %arg1: i32) -> (i32, i32, i32) {
    %c0_i32 = arith.constant 0 : i32
    %c0_i32_0 = arith.constant 0 : i32
    %c0_i32_1 = arith.constant 0 : i32
    return %arg0, %c0_i32, %c0_i32_0 : i32, i32, i32
  }
  func.func @transform_3(%arg0: i32, %arg1: i32) -> (i32, i32, i32) {
    %c0_i32 = arith.constant 0 : i32
    %c0_i32_0 = arith.constant 0 : i32
    %c0_i32_1 = arith.constant 0 : i32
    return %arg0, %c0_i32, %c0_i32_0 : i32, i32, i32
  }
}

</mosaic_0001>

<bundles_post_ra>
// kernel: tpu_custom_call.1
= control target key start
LH: loop header
LB: loop body
LE: loop exit
PB: predicated region body
PF: predicated region fallthrough
CT: control target
= control target key end

     0   :  { %9 = vsyncpa [#allocation3], 0  ;;  %s320_s0 = inlined_call_operand.hbm [shape: f32[32,128], index: 0, kind: input, shape index: {}]   ;;  %s321_s1 = inlined_call_operand.hbm [shape: f32[32,128], index: 1, kind: input, shape index: {}]   ;;  %s322_s2 = inlined_call_operand.hbm [shape: f32[1,8,128], index: 2, kind: output, shape index: {0}]   ;;  %s323_s3 = inlined_call_operand.hbm [shape: f32[1,8,128], index: 3, kind: output, shape index: {1}]  }
   0x1   :  { %10 = vsyncpa [#allocation6], 0 }
   0x2   :  { %11 = vsyncpa [#allocation4], 0 }
   0x3   :  { %12 = vsyncpa [#allocation9], 0  ;;  %s246_s12 = smov [#allocation2]   ;;  %s150_s16 = scalar_lea.hbm %s320_s0, 512 }
   0x4   :  { %s22_s13 = sshll.u32 %s246_s12, 4  ;;  %p151_p0 = scmp.ne.s32.totalorder %s320_s0, %s150_s16  ;;  %s23_s13 = int_to_ptr.vmem [resolvable:$true] %s22_s13 }
   0x5   :  { %p154_p1 = scmp.lt.u32.totalorder %s150_s16, %s320_s0 }
   0x7   :  { %p156_p2 = pnand %p154_p1, %p151_p0 }
   0x9   :  { %159 = shalt.err (!%p156_p2)
}
   0xa   :  { %s160_s21 = scalar_lea.vmem %s23_s13, 512  ;;  %p165_p4 = scmp.lt.s32.totalorder %s23_s13, %s23_s13 }
   0xb   :  { %p161_p3 = scmp.ne.s32.totalorder %s23_s13, %s160_s21  ;;  %p166_p5 = scmp.lt.s32.totalorder %s160_s21, %s160_s21 }
   0xd   :  { %p167_p6 = por %p166_p5, %p165_p4 }
   0xf   :  { %p168_p7 = pnand %p167_p6, %p161_p3 }
  0x11   :  { %171 = shalt.err (!%p168_p7)
}
  0x12   :  { %s247_s22 = smov 128   ;;  %s248_s23 = smov 8  }
  0x13   :  { %28 = dma.hbm_to_vmem [thread:$0]  %s320_s0, 512, %s23_s13, [#allocation3], %s247_s22, %s247_s22, %s248_s23  }
  0x14   :  { %s249_s26 = smov [#allocation5]   ;;  %s172_s30 = scalar_lea.hbm %s321_s1, 512 }
  0x15   :  { %s38_s27 = sshll.u32 %s249_s26, 4  ;;  %p173_p8 = scmp.ne.s32.totalorder %s321_s1, %s172_s30  ;;  %s39_s27 = int_to_ptr.vmem [resolvable:$true] %s38_s27 }
  0x16   :  { %p176_p9 = scmp.lt.u32.totalorder %s172_s30, %s321_s1 }
  0x18   :  { %p178_p10 = pnand %p176_p9, %p173_p8 }
  0x1a   :  { %181 = shalt.err (!%p178_p10)
}
  0x1b   :  { %s182_s8 = scalar_lea.vmem %s39_s27, 512  ;;  %p187_p12 = scmp.lt.s32.totalorder %s39_s27, %s39_s27 }
  0x1c   :  { %p183_p11 = scmp.ne.s32.totalorder %s39_s27, %s182_s8  ;;  %p188_p13 = scmp.lt.s32.totalorder %s182_s8, %s182_s8 }
  0x1e   :  { %p189_p0 = por %p188_p13, %p187_p12 }
  0x20   :  { %p190_p1 = pnand %p189_p0, %p183_p11 }
  0x22   :  { %193 = shalt.err (!%p190_p1)
}
  0x23   :  { %44 = dma.hbm_to_vmem [thread:$0]  %s321_s1, 512, %s39_s27, [#allocation6], %s247_s22, %s247_s22, %s248_s23  }
  0x24   :  { %238 = dma.done.wait [#allocation3], 512  }
  0x25   :  { %239 = vsyncadd [#allocation3], 4294966784 }
  0x26   :  { %240 = dma.done.wait [#allocation6], 512  }
  0x27   :  { %241 = vsyncadd [#allocation6], 4294966784  ;;  %v61_v0 = vld [vmem:[#allocation2] sm:$0xff]  ;;  %v62_v1 = vld [vmem:[#allocation2 + $0x8] sm:$0xff]  ;;  %s250_s1 = smov [#allocation7]   ;;  %s251_s11 = smov [#allocation8]  }
  0x28   :  { %v63_v2 = vld [vmem:[#allocation2 + $0x10] sm:$0xff]  ;;  %v64_v3 = vld [vmem:[#allocation2 + $0x18] sm:$0xff]  ;;  %v69_v4 = vmul.f32 0.5, %v61_v0  ;;  %v70_v5 = vmul.f32 0.5, %v62_v1  ;;  %v65_v12 = vld [vmem:[#allocation5] sm:$0xff]  ;;  %s111_s10 = sshll.u32 %s250_s1, 4  ;;  %s112_s10 = int_to_ptr.vmem [resolvable:$true] %s111_s10 }
  0x29   :  { %v71_v6 = vmul.f32 0.5, %v63_v2  ;;  %v72_v7 = vmul.f32 0.5, %v64_v3  ;;  %v66_v15 = vld [vmem:[#allocation5 + $0x8] sm:$0xff]  ;;  %v67_v18 = vld [vmem:[#allocation5 + $0x10] sm:$0xff]  ;;  %v68_v21 = vld [vmem:[#allocation5 + $0x18] sm:$0xff]  ;;  %s121_s12 = sshll.u32 %s251_s11, 4  ;;  %p199_p3 = scmp.lt.s32.totalorder %s112_s10, %s112_s10  ;;  %s122_s12 = int_to_ptr.vmem [resolvable:$true] %s121_s12 }
  0x2a   :  { %142 = vtanh.f32 %v69_v4  ;;  %s194_s13 = scalar_lea.vmem %s112_s10, 128 }
  0x2b   :  { %144 = vtanh.f32 %v70_v5  ;;  %p195_p2 = scmp.ne.s32.totalorder %s112_s10, %s194_s13  ;;  %p200_p4 = scmp.lt.s32.totalorder %s194_s13, %s194_s13 }
  0x2c   :  { %146 = vtanh.f32 %v71_v6 }
  0x2d   :  { %148 = vtanh.f32 %v72_v7  ;;  %p201_p5 = por %p200_p4, %p199_p3 }
  0x2f   :  { %p202_p6 = pnand %p201_p5, %p195_p2 }
  0x34   :  { %v143_v8 = vpop.eup %142 }
  0x35   :  { %v145_v9 = vpop.eup %144  ;;  %v77_v10 = vmul.f32 0.5, %v143_v8 }
  0x36   :  { %v147_v11 = vpop.eup %146  ;;  %v78_v13 = vmul.f32 0.5, %v145_v9 }
  0x37   :  { %v149_v14 = vpop.eup %148  ;;  %v79_v16 = vmul.f32 0.5, %v147_v11  ;;  %v81_v17 = vadd.f32 0.5, %v77_v10 }
  0x38   :  { %v80_v19 = vmul.f32 0.5, %v149_v14  ;;  %v82_v20 = vadd.f32 0.5, %v78_v13 }
  0x39   :  { %v83_v22 = vadd.f32 0.5, %v79_v16  ;;  %v86_v23 = vmul.f32 %v81_v17, %v65_v12  ;;  %v96_v24 = vadd.f32 %v81_v17, %v65_v12 }
  0x3a   :  { %v84_v25 = vadd.f32 0.5, %v80_v19  ;;  %v87_v26 = vmul.f32 %v82_v20, %v66_v15  ;;  %v97_v27 = vadd.f32 %v82_v20, %v66_v15 }
  0x3b   :  { %v88_v28 = vmul.f32 %v83_v22, %v67_v18  ;;  %v98_v29 = vadd.f32 %v83_v22, %v67_v18 }
  0x3c   :  { %v89_v30 = vmul.f32 %v84_v25, %v68_v21  ;;  %v90_v31 = vadd.f32 %v87_v26, %v86_v23  ;;  %v99_v32 = vadd.f32 %v84_v25, %v68_v21  ;;  %v100_v33 = vadd.f32 %v97_v27, %v96_v24 }
  0x3e   :  { %v91_v34 = vadd.f32 %v90_v31, %v88_v28  ;;  %v101_v35 = vadd.f32 %v100_v33, %v98_v29 }
  0x40   :  { %v92_v36 = vadd.f32 %v91_v34, %v89_v30  ;;  %v102_v37 = vadd.f32 %v101_v35, %v99_v32 }
  0x42   :  { %94 = vst [vmem:[#allocation7] sm:$0xff] %v92_v36  ;;  %104 = vst [vmem:[#allocation8] sm:$0xff] %v102_v37 }
  0x43   :  { %205 = shalt.err (!%p202_p6)
}
  0x44   :  { %s206_s16 = scalar_lea.hbm %s322_s2, 128 }
  0x45   :  { %p207_p7 = scmp.ne.s32.totalorder %s322_s2, %s206_s16  ;;  %p210_p8 = scmp.lt.u32.totalorder %s206_s16, %s322_s2 }
  0x47   :  { %p212_p9 = pnand %p210_p8, %p207_p7 }
  0x49   :  { %215 = shalt.err (!%p212_p9)
}
  0x4a   :  { %114 = dma.vmem_to_hbm [thread:$0]  %s112_s10, 128, %s322_s2, [#allocation4]  }
  0x4b   :  { %s216_s23 = scalar_lea.vmem %s122_s12, 128  ;;  %p221_p11 = scmp.lt.s32.totalorder %s122_s12, %s122_s12 }
  0x4c   :  { %p217_p10 = scmp.ne.s32.totalorder %s122_s12, %s216_s23  ;;  %p222_p12 = scmp.lt.s32.totalorder %s216_s23, %s216_s23 }
  0x4e   :  { %p223_p13 = por %p222_p12, %p221_p11 }
  0x50   :  { %p224_p0 = pnand %p223_p13, %p217_p10 }
  0x52   :  { %227 = shalt.err (!%p224_p0)
}
  0x53   :  { %s228_s26 = scalar_lea.hbm %s323_s3, 128 }
  0x54   :  { %p229_p1 = scmp.ne.s32.totalorder %s323_s3, %s228_s26  ;;  %p232_p2 = scmp.lt.u32.totalorder %s228_s26, %s323_s3 }
  0x56   :  { %p234_p3 = pnand %p232_p2, %p229_p1 }
  0x58   :  { %237 = shalt.err (!%p234_p3)
}
  0x59   :  { %124 = dma.vmem_to_hbm [thread:$0]  %s122_s12, 128, %s323_s3, [#allocation9]  }
  0x5a   :  { %242 = dma.done.wait [#allocation4], 128  }
  0x5b   :  { %243 = vsyncadd [#allocation4], 4294967168 }
  0x5c   :  { %244 = dma.done.wait [#allocation9], 128  }
  0x5d   :  { %245 = vsyncadd [#allocation9], 4294967168 }
  0x5e   :  { %131 = vsyncpa [#allocation3], 1 }
  0x5f   :  { %132 = vsyncpa [#allocation6], 1 }
  0x60   :  { %133 = vsyncpa [#allocation4], 1 }
  0x61   :  { %134 = vsyncpa [#allocation9], 1 }

</bundles_post_ra>
